<compile_context>
chip_gen: v6e
topology: v6e:2x2x1
jax: 0.10.0
libtpu: 0.0.40
codegen_flags: <defaults>
</compile_context>

<pallas_src>
import math
import functools

import jax
import jax.numpy as jnp
from jax import lax
from jax.experimental import pallas as pl
from jax.experimental.pallas import tpu as pltpu


def _round_up(v, m):
    return ((v + m - 1) // m) * m


def _linear_kernel(x_ref, w_ref, b_ref, o_ref, acc_ref):
    """grid = (Mp//tm, Np//tn, Kp//tk); reduction axis k is last ('arbitrary').

    x_ref:   (tm, tk)  activation tile
    w_ref:   (tn, tk)  weight tile in native (out_dim, in_dim) layout
    b_ref:   (1, tn)   bias tile
    o_ref:   (tm, tn)  output tile (lane-dense along output_dim)
    acc_ref: (tm, tn)  f32 accumulator, persists across the k axis
    """
    @pl.when(pl.program_id(2) == 0)
    def _():
        acc_ref[...] = jnp.zeros_like(acc_ref)

    # Contract the last axis of both operands (== x @ w.T) so the weight is
    # consumed as-is, without any XLA transpose in the wrapper.
    acc_ref[...] += lax.dot_general(
        x_ref[...],
        w_ref[...],
        dimension_numbers=(((1,), (1,)), ((), ())),
        preferred_element_type=jnp.float32,
    )

    @pl.when(pl.program_id(2) == pl.num_programs(2) - 1)
    def _():
        o_ref[...] = (acc_ref[...] + b_ref[...].astype(jnp.float32)).astype(
            o_ref.dtype
        )


@functools.partial(jax.jit, static_argnames=("tm", "tn", "tk", "compute_dtype"))
def my_linear(x, weight, bias=None, *, tm=256, tn=256, tk=512, compute_dtype=None):
    """y = x @ weight.T + bias   (matches MyLinearFunction.forward).

    x:      (M, K)
    weight: (N, K)  -- PyTorch layout, consumed directly (no transpose)
    bias:   (N,) or None
    compute_dtype: optional lower-precision MXU operand dtype (e.g. bf16);
                   accumulation stays f32.
    """
    M, K = x.shape
    N, K2 = weight.shape
    assert K == K2, (K, K2)
    out_dtype = x.dtype

    if bias is None:
        bias = jnp.zeros((N,), dtype=out_dtype)

    # Clamp tiles to the hardware-aligned problem size so small shapes do not
    # allocate oversized blocks; tm stays a multiple of 8, tn/tk of 128.
    tm = min(tm, _round_up(M, 8))
    tn = min(tn, _round_up(N, 128))
    tk = min(tk, _round_up(K, 128))

    # Pad so each tile divides exactly.  Zero padding along K contributes
    # nothing to the dot product; padded M/N rows/cols are sliced off below.
    Mp, Np, Kp = _round_up(M, tm), _round_up(N, tn), _round_up(K, tk)
    if (Mp, Kp) != (M, K):
        x = jnp.pad(x, ((0, Mp - M), (0, Kp - K)))
    if (Np, Kp) != (N, K):
        weight = jnp.pad(weight, ((0, Np - N), (0, Kp - K)))
    if Np != N:
        bias = jnp.pad(bias, (0, Np - N))
    b2d = bias.reshape(1, Np)

    if compute_dtype is not None:
        x = x.astype(compute_dtype)
        weight = weight.astype(compute_dtype)

    grid = (pl.cdiv(Mp, tm), pl.cdiv(Np, tn), pl.cdiv(Kp, tk))
    assert Mp % tm == 0 and Np % tn == 0 and Kp % tk == 0

    in_bytes = jnp.dtype(x.dtype).itemsize
    cost = pl.CostEstimate(
        flops=2 * Mp * Np * Kp,
        transcendentals=0,
        bytes_accessed=(Mp * Kp + Np * Kp) * in_bytes
        + Mp * Np * jnp.dtype(out_dtype).itemsize
        + Np * jnp.dtype(bias.dtype).itemsize,
    )

    out = pl.pallas_call(
        _linear_kernel,
        out_shape=jax.ShapeDtypeStruct((Mp, Np), out_dtype),
        grid_spec=pltpu.PrefetchScalarGridSpec(
            num_scalar_prefetch=0,
            grid=grid,
            in_specs=[
                pl.BlockSpec((tm, tk), lambda i, j, k: (i, k)),  # x tile
                pl.BlockSpec((tn, tk), lambda i, j, k: (j, k)),  # weight (N,K) tile
                pl.BlockSpec((1, tn), lambda i, j, k: (0, j)),   # bias tile
            ],
            out_specs=pl.BlockSpec((tm, tn), lambda i, j, k: (i, j)),
            scratch_shapes=[pltpu.VMEM((tm, tn), jnp.float32)],
        ),
        compiler_params=pltpu.CompilerParams(
            dimension_semantics=("parallel", "parallel", "arbitrary"),
        ),
        cost_estimate=cost,
    )(x, weight, b2d)

    if (Mp, Np) != (M, N):
        out = out[:M, :N]
    return out


def init_params(key, input_dim, output_dim, dtype=jnp.float32):
    # Mirrors nn.init.kaiming_uniform_ (a=0, fan_in, leaky_relu):
    # bound = sqrt(6 / fan_in); bias initialized to zeros.
    bound = math.sqrt(6.0 / input_dim)
    weight = jax.random.uniform(
        key, (output_dim, input_dim), dtype=dtype, minval=-bound, maxval=bound
    )
    bias = jnp.zeros((output_dim,), dtype=dtype)
    return weight, bias


if __name__ == "__main__":
    # Small shapes consistent with the module.
    batch, input_dim, output_dim = 8, 32, 64

    key = jax.random.PRNGKey(0)
    kx, kw = jax.random.split(key)
    x = jax.random.normal(kx, (batch, input_dim), dtype=jnp.float32)
    weight, bias = init_params(kw, input_dim, output_dim)

    y = jax.block_until_ready(my_linear(x, weight, bias))
    y_ref = x @ weight.T + bias
    assert y.shape == (batch, output_dim)
    assert jnp.allclose(y, y_ref, atol=1e-5, rtol=1e-5)

    # Second check: non-divisible shapes with a multi-iteration grid on all
    # three axes (exercises padding, pipelining and the k-accumulator).
    M2, K2, N2 = 100, 200, 160
    x2 = jax.random.normal(kx, (M2, K2), dtype=jnp.float32)
    w2, b2 = init_params(kw, K2, N2)
    y2 = jax.block_until_ready(my_linear(x2, w2, b2, tm=64, tn=128, tk=128))
    y2_ref = x2 @ w2.T + b2
    assert y2.shape == (M2, N2)
    assert jnp.allclose(y2, y2_ref, atol=1e-2, rtol=1e-2)

    print("KERNEL_OK")
</pallas_src>

<mosaic_0001>
module attributes {stable_mosaic.version = 11 : i64} {
  func.func @_linear_kernel(%arg0: i32, %arg1: i32, %arg2: i32, %arg3: memref<8x128xf32, #tpu.memory_space<vmem>>, %arg4: memref<128x128xf32, #tpu.memory_space<vmem>>, %arg5: memref<1x128xf32, #tpu.memory_space<vmem>>, %arg6: memref<8x128xf32, #tpu.memory_space<vmem>>, %arg7: memref<8x128xf32, #tpu.memory_space<vmem>>) attributes {dimension_semantics = [#tpu.dimension_semantics<parallel>, #tpu.dimension_semantics<parallel>, #tpu.dimension_semantics<arbitrary>], iteration_bounds = array<i64: 1, 1, 1>, scalar_prefetch = 0 : i64, scratch_operands = 1 : i64, tpu.core_type = #tpu.core_type<tc>, window_params = [{transform_indices = @transform_0, window_bounds = array<i64: 8, 128>}, {transform_indices = @transform_1, window_bounds = array<i64: 128, 128>}, {transform_indices = @transform_2, window_bounds = array<i64: 1, 128>}, {transform_indices = @transform_3, window_bounds = array<i64: 8, 128>}]} {
    %c0_i32 = arith.constant 0 : i32
    %0 = arith.cmpi eq, %arg2, %c0_i32 : i32
    %1 = arith.extui %0 : i1 to i32
    %c0_i32_0 = arith.constant 0 : i32
    %2 = arith.cmpi ne, %1, %c0_i32_0 : i32
    scf.if %2 {
      %cst_10 = arith.constant 0.000000e+00 : f32
      %12 = vector.broadcast %cst_10 : f32 to vector<8x128xf32>
      %c0_11 = arith.constant 0 : index
      %c0_12 = arith.constant 0 : index
      %13 = vector.load %arg7[%c0_11, %c0_12] : memref<8x128xf32, #tpu.memory_space<vmem>>, vector<8x128xf32>
      tpu.vector_store %arg7[%c0_11, %c0_12], %12 {strides = array<i32>} : memref<8x128xf32, #tpu.memory_space<vmem>>, vector<8x128xf32>,
    } else {
    }
    %c0 = arith.constant 0 : index
    %c0_1 = arith.constant 0 : index
    %3 = vector.load %arg7[%c0, %c0_1] : memref<8x128xf32, #tpu.memory_space<vmem>>, vector<8x128xf32>
    %c0_2 = arith.constant 0 : index
    %c0_3 = arith.constant 0 : index
    %4 = vector.load %arg3[%c0_2, %c0_3] : memref<8x128xf32, #tpu.memory_space<vmem>>, vector<8x128xf32>
    %c0_4 = arith.constant 0 : index
    %c0_5 = arith.constant 0 : index
    %5 = vector.load %arg4[%c0_4, %c0_5] : memref<128x128xf32, #tpu.memory_space<vmem>>, vector<128x128xf32>
    %cst = arith.constant dense<0.000000e+00> : vector<8x128xf32>
    %6 = tpu.matmul %4, %5, %cst {dimension_numbers = #tpu.dot_dimension_numbers<[1], [1], [0], [0], [0, 0, 1, 0], [], []>} : vector<8x128xf32>, vector<128x128xf32>, vector<8x128xf32> -> vector<8x128xf32>
    %7 = arith.addf %3, %6 : vector<8x128xf32>
    %c0_6 = arith.constant 0 : index
    %c0_7 = arith.constant 0 : index
    %8 = vector.load %arg7[%c0_6, %c0_7] : memref<8x128xf32, #tpu.memory_space<vmem>>, vector<8x128xf32>
    tpu.vector_store %arg7[%c0_6, %c0_7], %7 {strides = array<i32>} : memref<8x128xf32, #tpu.memory_space<vmem>>, vector<8x128xf32>,
    %c0_i32_8 = arith.constant 0 : i32
    %9 = arith.cmpi eq, %arg2, %c0_i32_8 : i32
    %10 = arith.extui %9 : i1 to i32
    %c0_i32_9 = arith.constant 0 : i32
    %11 = arith.cmpi ne, %10, %c0_i32_9 : i32
    scf.if %11 {
      %c0_10 = arith.constant 0 : index
      %c0_11 = arith.constant 0 : index
      %12 = vector.load %arg7[%c0_10, %c0_11] : memref<8x128xf32, #tpu.memory_space<vmem>>, vector<8x128xf32>
      %c0_12 = arith.constant 0 : index
      %c0_13 = arith.constant 0 : index
      %13 = vector.load %arg5[%c0_12, %c0_13] : memref<1x128xf32, #tpu.memory_space<vmem>>, vector<1x128xf32>
      %14 = vector.broadcast %13 : vector<1x128xf32> to vector<8x128xf32>
      %15 = arith.addf %12, %14 : vector<8x128xf32>
      %c0_14 = arith.constant 0 : index
      %c0_15 = arith.constant 0 : index
      %16 = vector.load %arg6[%c0_14, %c0_15] : memref<8x128xf32, #tpu.memory_space<vmem>>, vector<8x128xf32>
      tpu.vector_store %arg6[%c0_14, %c0_15], %15 {strides = array<i32>} : memref<8x128xf32, #tpu.memory_space<vmem>>, vector<8x128xf32>,
    } else {
    }
    return
  }
  func.func @transform_0(%arg0: i32, %arg1: i32, %arg2: i32) -> (i32, i32) {
    %c0_i32 = arith.constant 0 : i32
    return %arg0, %arg2 : i32, i32
  }
  func.func @transform_1(%arg0: i32, %arg1: i32, %arg2: i32) -> (i32, i32) {
    %c0_i32 = arith.constant 0 : i32
    return %arg1, %arg2 : i32, i32
  }
  func.func @transform_2(%arg0: i32, %arg1: i32, %arg2: i32) -> (i32, i32) {
    %c0_i32 = arith.constant 0 : i32
    %c0_i32_0 = arith.constant 0 : i32
    return %c0_i32, %arg1 : i32, i32
  }
  func.func @transform_3(%arg0: i32, %arg1: i32, %arg2: i32) -> (i32, i32) {
    %c0_i32 = arith.constant 0 : i32
    return %arg0, %arg1 : i32, i32
  }
}

</mosaic_0001>

<bundles_post_ra>
// kernel: my_linear.1
= control target key start
LH: loop header
LB: loop body
LE: loop exit
PB: predicated region body
PF: predicated region fallthrough
CT: control target
= control target key end

     0   :  { %v215_v1 = vmov 0.0   ;;  %vm216_vm0 = vmmov 0   ;;  %s295_s0 = inlined_call_operand.vmem [shape: f32[8,128], index: 0, kind: input, shape index: {}]   ;;  %s296_s1 = inlined_call_operand.vmem [shape: f32[128,128], index: 1, kind: input, shape index: {}]   ;;  %s297_s2 = inlined_call_operand.vmem [shape: f32[1,128], index: 2, kind: input, shape index: {}]   ;;  %s298_s3 = inlined_call_operand.hbm [shape: f32[8,128], index: 3, kind: output, shape index: {}]  }
   0x1   :  { %v37_v0 = vld [vmem:[%s296_s1 + $0x78] sm:$0xff]  ;;  %155 = vmatprep.subr.mxu0 %v215_v1  ;;  %187 = vmatprep.mubr.msk.f32.mxu0 %vm216_vm0, %v215_v1  ;;  %v36_v2 = vld [vmem:[%s296_s1 + $0x70] sm:$0xff] }
   0x2   :  { %156 = vmatpush3.xpose.msra.mxu0 %v37_v0 }
   0x3   :  { %157 = vmatprep.subr.mxu0 %v215_v1 }
   0x4   :  { %8 = vsyncpa [#allocation4], 0  ;;  %v35_v3 = vld [vmem:[%s296_s1 + $0x68] sm:$0xff]  ;;  %v34_v4 = vld [vmem:[%s296_s1 + $0x60] sm:$0xff]  ;;  %s217_s21 = smov [#allocation3]  }
   0x5   :  { %v33_v5 = vld [vmem:[%s296_s1 + $0x58] sm:$0xff]  ;;  %v32_v6 = vld [vmem:[%s296_s1 + $0x50] sm:$0xff]  ;;  %v31_v7 = vld [vmem:[%s296_s1 + $0x48] sm:$0xff]  ;;  %s129_s22 = sshll.u32 %s217_s21, 4  ;;  %s130_s22 = int_to_ptr.vmem [resolvable:$true] %s129_s22 }
   0x6   :  { %158 = vmatpush3.xpose.msra.mxu0 %v36_v2  ;;  %v30_v8 = vld [vmem:[%s296_s1 + $0x40] sm:$0xff]  ;;  %v29_v9 = vld [vmem:[%s296_s1 + $0x38] sm:$0xff]  ;;  %v28_v10 = vld [vmem:[%s296_s1 + $0x30] sm:$0xff]  ;;  %s193_s23 = scalar_lea.vmem %s130_s22, 128  ;;  %p198_p1 = scmp.lt.s32.totalorder %s130_s22, %s130_s22 }
   0x7   :  { %159 = vmatprep.subr.mxu0 %v215_v1  ;;  %v27_v11 = vld [vmem:[%s296_s1 + $0x28] sm:$0xff]  ;;  %v26_v12 = vld [vmem:[%s296_s1 + $0x20] sm:$0xff]  ;;  %v25_v13 = vld [vmem:[%s296_s1 + $0x18] sm:$0xff]  ;;  %p194_p0 = scmp.ne.s32.totalorder %s130_s22, %s193_s23  ;;  %p199_p2 = scmp.lt.s32.totalorder %s193_s23, %s193_s23 }
   0x8   :  { %v24_v14 = vld [vmem:[%s296_s1 + $0x10] sm:$0xff]  ;;  %v23_v15 = vld [vmem:[%s296_s1 + $0x8] sm:$0xff]  ;;  %v22_v16 = vld [vmem:[%s296_s1] sm:$0xff] }
   0x9   :  { %v21_v17 = vld [vmem:[%s295_s0] sm:$0xff]  ;;  %p200_p3 = por %p199_p2, %p198_p1 }
   0xa   :  { %160 = vmatpush3.xpose.msra.mxu0 %v35_v3  ;;  %v137_v18 = vld [vmem:[%s297_s2] ss:$0 sm:$0xff] }
   0xb   :  { %161 = vmatprep.subr.mxu0 %v215_v1  ;;  %p201_p4 = pnand %p200_p3, %p194_p0 }
   0xe   :  { %162 = vmatpush3.xpose.msra.mxu0 %v34_v4 }
   0xf   :  { %163 = vmatprep.subr.mxu0 %v215_v1 }
  0x12   :  { %164 = vmatpush3.xpose.msra.mxu0 %v33_v5 }
  0x13   :  { %165 = vmatprep.subr.mxu0 %v215_v1 }
  0x16   :  { %166 = vmatpush3.xpose.msra.mxu0 %v32_v6 }
  0x17   :  { %167 = vmatprep.subr.mxu0 %v215_v1 }
  0x1a   :  { %168 = vmatpush3.xpose.msra.mxu0 %v31_v7 }
  0x1b   :  { %169 = vmatprep.subr.mxu0 %v215_v1 }
  0x1e   :  { %170 = vmatpush3.xpose.msra.mxu0 %v30_v8 }
  0x1f   :  { %171 = vmatprep.subr.mxu0 %v215_v1 }
  0x22   :  { %172 = vmatpush3.xpose.msra.mxu0 %v29_v9 }
  0x23   :  { %173 = vmatprep.subr.mxu0 %v215_v1 }
  0x26   :  { %174 = vmatpush3.xpose.msra.mxu0 %v28_v10 }
  0x27   :  { %175 = vmatprep.subr.mxu0 %v215_v1 }
  0x2a   :  { %176 = vmatpush3.xpose.msra.mxu0 %v27_v11 }
  0x2b   :  { %177 = vmatprep.subr.mxu0 %v215_v1 }
  0x2e   :  { %178 = vmatpush3.xpose.msra.mxu0 %v26_v12 }
  0x2f   :  { %179 = vmatprep.subr.mxu0 %v215_v1 }
  0x32   :  { %180 = vmatpush3.xpose.msra.mxu0 %v25_v13 }
  0x33   :  { %181 = vmatprep.subr.mxu0 %v215_v1 }
  0x36   :  { %182 = vmatpush3.xpose.msra.mxu0 %v24_v14 }
  0x37   :  { %183 = vmatprep.subr.mxu0 %v215_v1 }
  0x3a   :  { %184 = vmatpush3.xpose.msra.mxu0 %v23_v15 }
  0x3b   :  { %185 = vmatprep.subr.mxu0 %v215_v1 }
  0x3e   :  { %186 = vmatpush3.xpose.msra.mxu0 %v22_v16 }
  0x41   :  { %188 = vmatmul.mubr.f32.vlgmr.msra.gmra.mxu0 %v21_v17 }
 0x101   :  { %v104_v19 = vpop.f32.mrf.mxu0 }
 0x102   :  { %v121_v20 = vadd.f32 %v137_v18, %v104_v19 }
 0x103   :  { %v189_v21 = vpop.f32.mrf.mxu0 }
 0x104   :  { %122 = vst [vmem:[#allocation3] sm:$0xff] %v121_v20 }
 0x105   :  { %204 = shalt.err (!%p201_p4)
}
 0x106   :  { %132 = dma.vmem_to_hbm [thread:$0]  %s130_s22, 128, %s298_s3, [#allocation4]  }
 0x107   :  { %213 = dma.done.wait [#allocation4], 128  }
 0x108   :  { %214 = vsyncadd [#allocation4], 4294967168 }
 0x109   :  { %136 = vsyncpa [#allocation4], 1 }

</bundles_post_ra>
